<compile_context>
chip_gen: v7x
topology: tpu7x:2x2x1
jax: 0.10.0
libtpu: 0.0.40
codegen_flags: <defaults>
</compile_context>

<pallas_src>
import functools

import jax
import jax.numpy as jnp
from jax.experimental import pallas as pl
from jax.experimental.pallas import tpu as pltpu

_LANES = 128
_SUBLANES = 8
_FILL_BLOCK = 1 << 17     # 131072 lanes = 512 KiB f32 per fill block
_MAX_TILE_ROWS = 4096     # bound in-kernel unroll / code size


def _round_up(a, b):
    return ((a + b - 1) // b) * b


def _round_down(a, b):
    return (a // b) * b


def _device_kind():
    try:
        return jax.devices()[0].device_kind.lower()
    except Exception:
        return ""


def _tile_budget_bytes():
    kind = _device_kind()
    if "v7" in kind or "tpu7" in kind:
        return 4 << 20          # 8 MiB double-buffered << 32 MiB scoped VMEM
    if "v6" in kind:
        return 2 << 20
    return 1 << 20              # v5e / unknown: stay well under 16 MiB default


def _num_tensorcores():
    kind = _device_kind()
    return 2 if ("v7" in kind or "tpu7" in kind) else 1


# ---------------------------------------------------------------------------
# Init-time kernel: streaming row-partial-sum reduction of y (one HBM pass).
# ---------------------------------------------------------------------------
def _partial_sum_kernel(nrows, tile_rows, steps_per_core,
                        y_ref, psum_ref, acc_ref):
    core = pl.program_id(0)
    step = pl.program_id(1)

    @pl.when(step == 0)
    def _init():
        acc_ref[...] = jnp.zeros_like(acc_ref)

    blk = y_ref[...].astype(jnp.float32)
    tr, c = blk.shape
    row0 = (core * steps_per_core + step) * tile_rows   # logical first row

    # Full tile: pure VPU adds into the (8, C) accumulator (no XLU per step).
    @pl.when(row0 + tile_rows <= nrows)
    def _full_tile():
        acc_ref[...] += blk.reshape(tr // _SUBLANES, _SUBLANES, c).sum(axis=0)

    # Ragged / out-of-range tile: mask rows >= nrows (garbage in the padded
    # region of the block contributes exactly zero).
    @pl.when(row0 + tile_rows > nrows)
    def _ragged_tile():
        rows = row0 + jax.lax.broadcasted_iota(jnp.int32, (tr, c), 0)
        masked = jnp.where(rows < nrows, blk, 0.0)
        acc_ref[...] += masked.reshape(tr // _SUBLANES, _SUBLANES, c).sum(axis=0)

    @pl.when(step == steps_per_core - 1)
    def _finalize():
        s = jnp.sum(acc_ref[...])                       # one XLU reduce per core
        psum_ref[...] = jnp.broadcast_to(s, psum_ref.shape)


def _partial_sums(y2d, tile_rows, num_cores):
    """Row-streaming partial sums of a 2-D array -> (num_cores, 128) f32."""
    nrows, ncols = int(y2d.shape[0]), int(y2d.shape[1])
    assert tile_rows % _SUBLANES == 0
    total_steps = pl.cdiv(nrows, tile_rows)
    if total_steps < 2:
        num_cores = 1
    steps_per_core = pl.cdiv(total_steps, num_cores)

    kernel = functools.partial(_partial_sum_kernel, nrows, tile_rows,
                               steps_per_core)
    # Clamp to the last valid block: any fully out-of-range step is masked to
    # zero inside the kernel, so re-reading the last block is harmless.
    in_map = lambda c, s: (jnp.minimum(c * steps_per_core + s, total_steps - 1), 0)
    out_map = lambda c, s: (c, 0)

    bytes_in = int(y2d.size) * int(y2d.dtype.itemsize)
    return pl.pallas_call(
        kernel,
        out_shape=jax.ShapeDtypeStruct((num_cores, _LANES), jnp.float32),
        grid=(num_cores, steps_per_core),
        in_specs=[pl.BlockSpec((tile_rows, ncols), in_map)],
        out_specs=pl.BlockSpec((1, _LANES), out_map),
        scratch_shapes=[pltpu.VMEM((_SUBLANES, ncols), jnp.float32)],
        compiler_params=pltpu.CompilerParams(
            dimension_semantics=("parallel", "arbitrary")),
        cost_estimate=pl.CostEstimate(
            flops=int(y2d.size), transcendentals=0,
            bytes_accessed=bytes_in + num_cores * _LANES * 4),
    )(y2d)


def _mean_scalar(y, *, tile_rows=None, num_cores=None):
    """jnp.mean(y) via the Pallas streaming reduction; returns (1,) float32."""
    n = int(y.size)
    if n == 0:
        return jnp.full((1,), jnp.nan, dtype=jnp.float32)

    budget = _tile_budget_bytes()
    if num_cores is None:
        num_cores = _num_tensorcores()

    if y.ndim >= 2:
        y2d = y.reshape(-1, y.shape[-1])   # collapse leading dims (layout-preserving)
    else:
        y2d = y.reshape(1, -1)             # 0-D / 1-D: single logical row
    nrows, ncols = int(y2d.shape[0]), int(y2d.shape[1])

    if _SUBLANES * ncols * 4 > budget:
        # Rows too wide for even an 8-row tile: repack once into (rows, 1024).
        # (Rare fallback; the extra zero padding does not perturb the sum.)
        ncols = _SUBLANES * _LANES
        nrows = _round_up(pl.cdiv(n, ncols), _SUBLANES)
        flat = jnp.ravel(y)
        pad = nrows * ncols - n
        if pad:
            flat = jnp.concatenate([flat, jnp.zeros((pad,), dtype=flat.dtype)])
        y2d = flat.reshape(nrows, ncols)

    if tile_rows is None:
        tile_rows = _round_down(budget // (ncols * 4), _SUBLANES)
        tile_rows = max(_SUBLANES,
                        min(tile_rows, _MAX_TILE_ROWS, _round_up(nrows, _SUBLANES)))

    psums = _partial_sums(y2d, tile_rows, num_cores)
    return (jnp.sum(psums[:, 0]) * jnp.float32(1.0 / n)).reshape(1)


# ---------------------------------------------------------------------------
# Forward kernel: lane-dense broadcast fill of the cached mean.
# ---------------------------------------------------------------------------
def _fill_kernel(mean_ref, o_ref):
    o_ref[...] = jnp.full(o_ref.shape, mean_ref[0], dtype=o_ref.dtype)


def _mean_fill(batch, mean_arr):
    """(batch, 1) float32 filled with the cached mean."""
    batch = int(batch)
    b_pad = _round_up(max(batch, 1), _LANES)
    blk = min(b_pad, _FILL_BLOCK)
    b_pad = _round_up(b_pad, blk)
    out = pl.pallas_call(
        _fill_kernel,
        out_shape=jax.ShapeDtypeStruct((1, b_pad), jnp.float32),
        grid=(b_pad // blk,),
        in_specs=[pl.BlockSpec(memory_space=pltpu.MemorySpace.SMEM)],
        out_specs=pl.BlockSpec((1, blk), lambda i: (0, i)),
        compiler_params=pltpu.CompilerParams(dimension_semantics=("parallel",)),
    )(mean_arr)
    # Lane-dense slab -> (B, 1): layout plumbing only (tiny).
    return out[0, :batch].reshape(batch, 1)


class MeanPredictor:
    """Pallas port of the PyTorch MeanPredictor (mean cached at construction)."""

    def __init__(self, y):
        self._mean = _mean_scalar(y)     # (1,) float32, device-resident

    def forward(self, x):
        return _mean_fill(x.shape[0], self._mean)

    __call__ = forward


if __name__ == "__main__":
    key = jax.random.PRNGKey(0)
    kx, k1, k2, k3 = jax.random.split(key, 4)

    # x: NCHW; forward only uses the batch dimension.
    x = jax.random.normal(kx, (2, 4, 16, 16), dtype=jnp.float32)

    # (a) small 2-D targets (single tile, unmasked path).
    y_a = jax.random.normal(k1, (8, 128), dtype=jnp.float32)
    out_a = jax.block_until_ready(MeanPredictor(y_a)(x))
    ref_a = jnp.full((x.shape[0], 1), jnp.mean(y_a), dtype=jnp.float32)
    assert out_a.shape == (2, 1) and out_a.dtype == jnp.float32
    assert jnp.allclose(out_a, ref_a, rtol=1e-5, atol=1e-6)

    # (b) multi-step grid + ragged tail + 2-way core split (forced small tiles
    #     so masked / multi-core paths are exercised even at small shapes).
    y_b = jax.random.normal(k2, (1000, 256), dtype=jnp.float32)
    mean_b = _mean_scalar(y_b, tile_rows=64, num_cores=2)
    out_b = jax.block_until_ready(_mean_fill(x.shape[0], mean_b))
    ref_b = jnp.full((x.shape[0], 1), jnp.mean(y_b), dtype=jnp.float32)
    assert jnp.allclose(out_b, ref_b, rtol=1e-5, atol=1e-5)

    # (c) 1-D ragged targets (viewed as (1, N); no host-side pad/copy).
    y_c = jax.random.normal(k3, (1000,), dtype=jnp.float32)
    out_c = jax.block_until_ready(MeanPredictor(y_c)(x))
    ref_c = jnp.full((x.shape[0], 1), jnp.mean(y_c), dtype=jnp.float32)
    assert jnp.allclose(out_c, ref_c, rtol=1e-5, atol=1e-5)

    print("KERNEL_OK")
</pallas_src>

<mosaic_0001>
module attributes {stable_mosaic.version = 11 : i64} {
  func.func @_partial_sum_kernel(%arg0: i32, %arg1: i32, %arg2: memref<8x128xf32, #tpu.memory_space<vmem>>, %arg3: memref<1x128xf32, #tpu.memory_space<vmem>>, %arg4: memref<8x128xf32, #tpu.memory_space<vmem>>) attributes {dimension_semantics = [#tpu.dimension_semantics<parallel>, #tpu.dimension_semantics<arbitrary>], iteration_bounds = array<i64: 1, 1>, scalar_prefetch = 0 : i64, scratch_operands = 1 : i64, tpu.core_type = #tpu.core_type<tc>, window_params = [{transform_indices = @transform_0, window_bounds = array<i64: 8, 128>}, {transform_indices = @transform_1, window_bounds = array<i64: 1, 128>}]} {
    %c0_i32 = arith.constant 0 : i32
    %0 = arith.cmpi eq, %arg1, %c0_i32 : i32
    %1 = arith.extui %0 : i1 to i32
    %c0_i32_0 = arith.constant 0 : i32
    %2 = arith.cmpi ne, %1, %c0_i32_0 : i32
    scf.if %2 {
      %cst = arith.constant 0.000000e+00 : f32
      %18 = vector.broadcast %cst : f32 to vector<8x128xf32>
      %c0_10 = arith.constant 0 : index
      %c0_11 = arith.constant 0 : index
      %19 = vector.load %arg4[%c0_10, %c0_11] : memref<8x128xf32, #tpu.memory_space<vmem>>, vector<8x128xf32>
      tpu.vector_store %arg4[%c0_10, %c0_11], %18 {strides = array<i32>} : memref<8x128xf32, #tpu.memory_space<vmem>>, vector<8x128xf32>,
    } else {
    }
    %c0 = arith.constant 0 : index
    %c0_1 = arith.constant 0 : index
    %3 = vector.load %arg2[%c0, %c0_1] : memref<8x128xf32, #tpu.memory_space<vmem>>, vector<8x128xf32>
    %c1_i32 = arith.constant 1 : i32
    %4 = arith.muli %arg0, %c1_i32 : i32
    %5 = arith.addi %4, %arg1 : i32
    %c8_i32 = arith.constant 8 : i32
    %6 = arith.muli %5, %c8_i32 : i32
    %c8_i32_2 = arith.constant 8 : i32
    %7 = arith.addi %6, %c8_i32_2 : i32
    %c8_i32_3 = arith.constant 8 : i32
    %8 = arith.cmpi sle, %7, %c8_i32_3 : i32
    %9 = arith.extui %8 : i1 to i32
    %c0_i32_4 = arith.constant 0 : i32
    %10 = arith.cmpi ne, %9, %c0_i32_4 : i32
    scf.if %10 {
      %c0_10 = arith.constant 0 : index
      %c0_11 = arith.constant 0 : index
      %18 = vector.load %arg4[%c0_10, %c0_11] : memref<8x128xf32, #tpu.memory_space<vmem>>, vector<8x128xf32>
      %19 = vector.shape_cast %3 : vector<8x128xf32> to vector<1x8x128xf32>
      %cst = arith.constant dense<0.000000e+00> : vector<8x128xf32>
      %20 = vector.multi_reduction <add>, %19, %cst [0] : vector<1x8x128xf32> to vector<8x128xf32>
      %21 = arith.addf %18, %20 : vector<8x128xf32>
      %c0_12 = arith.constant 0 : index
      %c0_13 = arith.constant 0 : index
      %22 = vector.load %arg4[%c0_12, %c0_13] : memref<8x128xf32, #tpu.memory_space<vmem>>, vector<8x128xf32>
      tpu.vector_store %arg4[%c0_12, %c0_13], %21 {strides = array<i32>} : memref<8x128xf32, #tpu.memory_space<vmem>>, vector<8x128xf32>,
    } else {
    }
    %c8_i32_5 = arith.constant 8 : i32
    %11 = arith.addi %6, %c8_i32_5 : i32
    %c8_i32_6 = arith.constant 8 : i32
    %12 = arith.cmpi sgt, %11, %c8_i32_6 : i32
    %13 = arith.extui %12 : i1 to i32
    %c0_i32_7 = arith.constant 0 : i32
    %14 = arith.cmpi ne, %13, %c0_i32_7 : i32
    scf.if %14 {
      %18 = tpu.iota {dimensions = array<i32: 0>} : vector<8x128xi32>
      %19 = vector.broadcast %6 : i32 to vector<8x128xi32>
      %20 = arith.addi %19, %18 : vector<8x128xi32>
      %c8_i32_10 = arith.constant 8 : i32
      %21 = vector.broadcast %c8_i32_10 : i32 to vector<8x128xi32>
      %22 = arith.cmpi slt, %20, %21 : vector<8x128xi32>
      %cst = arith.constant 0.000000e+00 : f32
      %23 = vector.broadcast %cst : f32 to vector<8x128xf32>
      %24 = arith.select %22, %3, %23 : vector<8x128xi1>, vector<8x128xf32>
      %c0_11 = arith.constant 0 : index
      %c0_12 = arith.constant 0 : index
      %25 = vector.load %arg4[%c0_11, %c0_12] : memref<8x128xf32, #tpu.memory_space<vmem>>, vector<8x128xf32>
      %26 = vector.shape_cast %24 : vector<8x128xf32> to vector<1x8x128xf32>
      %cst_13 = arith.constant dense<0.000000e+00> : vector<8x128xf32>
      %27 = vector.multi_reduction <add>, %26, %cst_13 [0] : vector<1x8x128xf32> to vector<8x128xf32>
      %28 = arith.addf %25, %27 : vector<8x128xf32>
      %c0_14 = arith.constant 0 : index
      %c0_15 = arith.constant 0 : index
      %29 = vector.load %arg4[%c0_14, %c0_15] : memref<8x128xf32, #tpu.memory_space<vmem>>, vector<8x128xf32>
      tpu.vector_store %arg4[%c0_14, %c0_15], %28 {strides = array<i32>} : memref<8x128xf32, #tpu.memory_space<vmem>>, vector<8x128xf32>,
    } else {
    }
    %c0_i32_8 = arith.constant 0 : i32
    %15 = arith.cmpi eq, %arg1, %c0_i32_8 : i32
    %16 = arith.extui %15 : i1 to i32
    %c0_i32_9 = arith.constant 0 : i32
    %17 = arith.cmpi ne, %16, %c0_i32_9 : i32
    scf.if %17 {
      %c0_10 = arith.constant 0 : index
      %c0_11 = arith.constant 0 : index
      %18 = vector.load %arg4[%c0_10, %c0_11] : memref<8x128xf32, #tpu.memory_space<vmem>>, vector<8x128xf32>
      %19 = vector.shape_cast %18 : vector<8x128xf32> to vector<1x8x128xf32>
      %cst = arith.constant dense<0.000000e+00> : vector<1xf32>
      %20 = vector.multi_reduction <add>, %19, %cst [1, 2] : vector<1x8x128xf32> to vector<1xf32>
      %21 = vector.shape_cast %20 : vector<1xf32> to vector<1x1x1xf32>
      %22 = vector.extract %21[0, 0, 0] : f32 from vector<1x1x1xf32>
      %23 = vector.broadcast %22 : f32 to vector<1x128xf32>
      %c0_12 = arith.constant 0 : index
      %c0_13 = arith.constant 0 : index
      %24 = vector.load %arg3[%c0_12, %c0_13] : memref<1x128xf32, #tpu.memory_space<vmem>>, vector<1x128xf32>
      tpu.vector_store %arg3[%c0_12, %c0_13], %23 {strides = array<i32>} : memref<1x128xf32, #tpu.memory_space<vmem>>, vector<1x128xf32>,
    } else {
    }
    return
  }
  func.func @transform_0(%arg0: i32, %arg1: i32) -> (i32, i32) {
    %c1_i32 = arith.constant 1 : i32
    %0 = arith.muli %arg0, %c1_i32 : i32
    %1 = arith.addi %0, %arg1 : i32
    %c0_i32 = arith.constant 0 : i32
    %2 = arith.minsi %1, %c0_i32 : i32
    %c0_i32_0 = arith.constant 0 : i32
    %c0_i32_1 = arith.constant 0 : i32
    return %2, %c0_i32_0 : i32, i32
  }
  func.func @transform_1(%arg0: i32, %arg1: i32) -> (i32, i32) {
    %c0_i32 = arith.constant 0 : i32
    %c0_i32_0 = arith.constant 0 : i32
    return %arg0, %c0_i32 : i32, i32
  }
}

</mosaic_0001>

<bundles_post_ra>
// kernel: tpu_custom_call.1
= control target key start
LH: loop header
LB: loop body
LE: loop exit
PB: predicated region body
PF: predicated region fallthrough
CT: control target
= control target key end

     0   :  { %6 = vsyncpa [#allocation4], 0  ;;  %s180_s0 = inlined_call_operand.hbm [shape: f32[8,128], index: 0, kind: input, shape index: {}]   ;;  %s181_s1 = inlined_call_operand.hbm [shape: f32[1,128], index: 1, kind: output, shape index: {}]  }
   0x1   :  { %7 = vsyncpa [#allocation5], 0  ;;  %s144_s6 = smov [#allocation3]   ;;  %s96_s10 = scalar_lea.hbm %s180_s0, 128 }
   0x2   :  { %s19_s7 = sshll.u32 %s144_s6, 4  ;;  %p97_p0 = scmp.ne.s32.totalorder %s180_s0, %s96_s10  ;;  %s20_s7 = int_to_ptr.vmem [resolvable:$true] %s19_s7 }
   0x3   :  { %p100_p1 = scmp.lt.u32.totalorder %s96_s10, %s180_s0 }
   0x5   :  { %p102_p2 = pnand %p100_p1, %p97_p0 }
   0x7   :  { %105 = shalt.err (!%p102_p2)
}
   0x8   :  { %s106_s15 = scalar_lea.vmem %s20_s7, 128  ;;  %p111_p4 = scmp.lt.s32.totalorder %s20_s7, %s20_s7 }
   0x9   :  { %p107_p3 = scmp.ne.s32.totalorder %s20_s7, %s106_s15  ;;  %p112_p5 = scmp.lt.s32.totalorder %s106_s15, %s106_s15 }
   0xb   :  { %p113_p6 = por %p112_p5, %p111_p4 }
   0xd   :  { %p114_p7 = pnand %p113_p6, %p107_p3 }
   0xf   :  { %117 = shalt.err (!%p114_p7)
}
  0x10   :  { %22 = dma.hbm_to_vmem [thread:$0]  %s180_s0, 128, %s20_s7, [#allocation4]  }
  0x11   :  { %140 = dma.done.wait [#allocation4], 128  }
  0x12   :  { %141 = vsyncadd [#allocation4], 4294967168  ;;  %v34_v0 = vld [vmem:[#allocation3] sm:$0xff]  ;;  %s145_s18 = smov [#allocation6]  }
  0x13   :  { %64 = vadd.xlane.f32.xlu0 %v34_v0  ;;  %s81_s19 = sshll.u32 %s145_s18, 4  ;;  %s82_s19 = int_to_ptr.vmem [resolvable:$true] %s81_s19 }
  0x14   :  { %s118_s21 = scalar_lea.vmem %s82_s19, 16  ;;  %s122_s0 = scalar_lea.vmem %s82_s19, 32 }
  0x15   :  { %p119_p8 = scmp.ne.s32.totalorder %s82_s19, %s118_s21  ;;  %p123_p9 = scmp.lt.s32.totalorder %s82_s19, %s82_s19 }
  0x16   :  { %p124_p10 = scmp.lt.s32.totalorder %s122_s0, %s118_s21 }
  0x18   :  { %p125_p11 = por %p124_p10, %p123_p9 }
  0x1a   :  { %p126_p12 = pnand %p125_p11, %p119_p8 }
  0xa0   :  { %v65_v1 = vpop.xlane.xlu0 %64 }
  0xa1   :  { %v66_v2 = vrot.slane %v65_v1, 4 }
  0xa3   :  { %v67_v3 = vadd.f32 %v66_v2, %v65_v1 }
  0xa5   :  { %v68_v4 = vrot.slane %v67_v3, 2 }
  0xa7   :  { %v69_v5 = vadd.f32 %v68_v4, %v67_v3 }
  0xa9   :  { %v70_v6 = vrot.slane %v69_v5, 1 }
  0xab   :  { %v71_v7 = vadd.f32 %v70_v6, %v69_v5 }
  0xad   :  { %92 = vpush %v71_v7 }
  0xde   :  { %s93_s20 = spop %92 }
  0xdf   :  { %v73_v8 = vstv %s93_s20 }
  0xe0   :  { %74 = vst [vmem:[#allocation6] sm:$0x1] %v73_v8 }
  0xe1   :  { %129 = shalt.err (!%p126_p12)
}
  0xe2   :  { %s130_s24 = scalar_lea.hbm %s181_s1, 16 }
  0xe3   :  { %p131_p13 = scmp.ne.s32.totalorder %s181_s1, %s130_s24  ;;  %p134_p0 = scmp.lt.u32.totalorder %s130_s24, %s181_s1 }
  0xe5   :  { %p136_p1 = pnand %p134_p0, %p131_p13 }
  0xe7   :  { %139 = shalt.err (!%p136_p1)
}
  0xe8   :  { %84 = dma.vmem_to_hbm [thread:$0]  %s82_s19, 16, %s181_s1, [#allocation5]  }
  0xe9   :  { %142 = dma.done.wait [#allocation5], 16  }
  0xea   :  { %143 = vsyncadd [#allocation5], 4294967280 }
  0xeb   :  { %88 = vsyncpa [#allocation4], 1 }
  0xec   :  { %89 = vsyncpa [#allocation5], 1 }

</bundles_post_ra>
